<compile_context>
chip_gen: v7x
topology: tpu7x:2x2x1
jax: 0.10.0
libtpu: 0.0.40
codegen_flags: <defaults>
</compile_context>

<pallas_src>
import jax
import jax.numpy as jnp
from jax.experimental import pallas as pl
from jax.experimental.pallas import tpu as pltpu

_LANE_CANDIDATES = (8192, 4096, 2048, 1024, 512, 256, 128)
_SINGLE_BLOCK_BYTES = 1 << 20   # <= 1 MiB: one full-array VMEM block, no grid
_TARGET_TILE_BYTES = 2 << 20    # ~2 MiB tiles -> 4 live buffers ~ 8 MiB VMEM


def _copy_kernel(x_ref, o_ref):
    # Identity hot path: full-tile load + store through VMEM.
    o_ref[...] = x_ref[...]


def _lane_dense_2d(total):
    """Widest lane width (multiple of 128) dividing `total`, or None."""
    for lane_w in _LANE_CANDIDATES:
        if total % lane_w == 0:
            return total // lane_w, lane_w
    return None


def _pick_tile_rows(rows, lane_w, itemsize):
    """Largest power-of-two row tile (mult. of 8) dividing rows, <= target bytes."""
    for cand in (8192, 4096, 2048, 1024, 512, 256, 128, 64, 32, 16, 8):
        if rows % cand == 0 and cand * lane_w * itemsize <= _TARGET_TILE_BYTES:
            return cand
    return rows  # fall back to a single block over all rows


def _forward_impl(x):
    shape = x.shape
    total = x.size
    itemsize = jnp.dtype(x.dtype).itemsize
    nbytes = total * itemsize
    cost = pl.CostEstimate(flops=0, transcendentals=0, bytes_accessed=2 * nbytes)

    slab = _lane_dense_2d(total)

    if slab is None:
        # TODO(synk): element counts not divisible by 128 fall back to a single
        # full-array block (masked tail stores); pad if this becomes hot.
        return pl.pallas_call(
            _copy_kernel,
            out_shape=jax.ShapeDtypeStruct(shape, x.dtype),
            input_output_aliases={0: 0},
            cost_estimate=cost,
        )(x)

    rows, lane_w = slab
    x2d = x.reshape(rows, lane_w)  # lane-dense 2-D view (layout plumbing only)

    if nbytes <= _SINGLE_BLOCK_BYTES:
        # Tiny input: pure fixed overhead — no grid, no pipeline machinery.
        y2d = pl.pallas_call(
            _copy_kernel,
            out_shape=jax.ShapeDtypeStruct((rows, lane_w), x.dtype),
            input_output_aliases={0: 0},
            cost_estimate=cost,
        )(x2d)
        return y2d.reshape(shape)

    # Realistic sizes: ~2 MiB blocks, 1-D parallel grid (megacore on v7x),
    # auto double-buffered pipeline; 4 live buffers stay under v5e's 16 MiB
    # default scoped VMEM and well under v7x's 64 MiB physical VMEM.
    tile_rows = _pick_tile_rows(rows, lane_w, itemsize)
    grid = (rows // tile_rows,)
    y2d = pl.pallas_call(
        _copy_kernel,
        out_shape=jax.ShapeDtypeStruct((rows, lane_w), x.dtype),
        grid=grid,
        in_specs=[pl.BlockSpec((tile_rows, lane_w), lambda i: (i, 0))],
        out_specs=pl.BlockSpec((tile_rows, lane_w), lambda i: (i, 0)),
        input_output_aliases={0: 0},
        cost_estimate=cost,
        compiler_params=pltpu.CompilerParams(
            dimension_semantics=("parallel",),
        ),
    )(x2d)
    return y2d.reshape(shape)


# Donate the input so the output aliasing is a true in-place reuse of the HBM
# buffer (callers must not reuse `x` after the call).
model_template_forward = jax.jit(_forward_impl, donate_argnums=(0,))


if __name__ == "__main__":
    key = jax.random.PRNGKey(0)
    k_small, k_large = jax.random.split(key)

    # Primary small NCHW input consistent with a conv-style module template.
    x = jax.random.normal(k_small, (2, 4, 16, 16), dtype=jnp.float32)
    x_expected = jnp.copy(x)  # x is donated below; keep a reference copy
    y = jax.block_until_ready(model_template_forward(x))
    assert y.shape == x_expected.shape and y.dtype == x_expected.dtype
    assert bool(jnp.all(y == x_expected))

    # Secondary input exercising the tiled, parallel-grid, pipelined path.
    xl = jax.random.normal(k_large, (8, 16, 128, 128), dtype=jnp.float32)
    xl_expected = jnp.copy(xl)
    yl = jax.block_until_ready(model_template_forward(xl))
    assert yl.shape == xl_expected.shape and yl.dtype == xl_expected.dtype
    assert bool(jnp.all(yl == xl_expected))

    print("KERNEL_OK")
</pallas_src>

<mosaic_0001>
module attributes {stable_mosaic.version = 11 : i64} {
  func.func @_copy_kernel(%arg0: memref<1x2048xf32, #tpu.memory_space<vmem>>, %arg1: memref<1x2048xf32, #tpu.memory_space<vmem>>) attributes {dimension_semantics = [], scalar_prefetch = 0 : i64, scratch_operands = 0 : i64, tpu.core_type = #tpu.core_type<tc>} {
    %c0 = arith.constant 0 : index
    %c0_0 = arith.constant 0 : index
    %0 = vector.load %arg0[%c0, %c0_0] : memref<1x2048xf32, #tpu.memory_space<vmem>>, vector<1x2048xf32>
    %c0_1 = arith.constant 0 : index
    %c0_2 = arith.constant 0 : index
    %1 = vector.load %arg1[%c0_1, %c0_2] : memref<1x2048xf32, #tpu.memory_space<vmem>>, vector<1x2048xf32>
    tpu.vector_store %arg1[%c0_1, %c0_2], %0 {strides = array<i32>} : memref<1x2048xf32, #tpu.memory_space<vmem>>, vector<1x2048xf32>,
    return
  }
}

</mosaic_0001>

<bundles_post_ra>
// kernel: _forward_impl.1
= control target key start
LH: loop header
LB: loop body
LE: loop exit
PB: predicated region body
PF: predicated region fallthrough
CT: control target
= control target key end

     0   :  { %s38_s0 = inlined_call_operand.vmem [shape: f32[1,2048], index: 0, kind: input, shape index: {}, may-alias: {0,1}]   ;;  %s39_s1 = inlined_call_operand.vmem [shape: f32[1,2048], index: 1, kind: output, shape index: {}, may-alias: {0,1}]  }
   0x1   :  { %v8_v0 = vld [vmem:[%s38_s0] sm:$0xff]  ;;  %v9_v1 = vld [vmem:[%s38_s0 + $0x8] sm:$0xff] }
   0x2   :  { %10 = vst [vmem:[%s39_s1] sm:$0xff] %v8_v0  ;;  %11 = vst [vmem:[%s39_s1 + $0x8] sm:$0xff] %v9_v1 }

</bundles_post_ra>
